<compile_context>
chip_gen: v7x
topology: tpu7x:2x2x1
jax: 0.10.0
libtpu: 0.0.40
codegen_flags: <defaults>
</compile_context>

<pallas_src>
import functools

import jax
import jax.numpy as jnp
from jax.experimental import pallas as pl
from jax.experimental.pallas import tpu as pltpu

_INV_SQRT2 = 0.7071067811865476


def _round_up(x: int, m: int) -> int:
    return ((x + m - 1) // m) * m


# ---------------------------------------------------------------------------
# One-time hardware / toolchain queries (eager, at import time).
# ---------------------------------------------------------------------------

def _vmem_limit_bytes() -> int:
    """Per-generation VMEM request: physical capacity minus headroom for Mosaic
    internal scratch / semaphores, capped so we never ask for 100% of v7x's 64 MiB
    while still letting v5e/v6e (128 MiB) use a larger budget."""
    try:
        phys = int(pltpu.get_tpu_info().vmem_capacity_bytes)
    except Exception:
        phys = 64 * 1024 * 1024  # conservative (v7x-sized) assumption
    return max(32 * 1024 * 1024, min(phys - 16 * 1024 * 1024, 96 * 1024 * 1024))


def _probe_single_buffering() -> bool:
    """pl.Buffered(1) single-buffers grid-invariant operands (halves the resident
    weight VMEM).  Probe once so we fall back cleanly if this toolchain does not
    support pipeline_mode on TPU pallas_call."""
    try:
        def _k(a_ref, c_ref, o_ref):
            o_ref[...] = a_ref[...] + c_ref[...]

        f = pl.pallas_call(
            _k,
            out_shape=jax.ShapeDtypeStruct((16, 128), jnp.float32),
            grid=(2,),
            in_specs=[
                pl.BlockSpec((8, 128), lambda i: (i, 0)),
                pl.BlockSpec((8, 128), lambda i: (0, 0),
                             pipeline_mode=pl.Buffered(1)),
            ],
            out_specs=pl.BlockSpec((8, 128), lambda i: (i, 0)),
        )
        out = jax.block_until_ready(
            f(jnp.zeros((16, 128), jnp.float32), jnp.ones((8, 128), jnp.float32)))
        return bool(jnp.all(out == 1.0))
    except Exception:
        return False


_VMEM_LIMIT = _vmem_limit_bytes()
_VMEM_BUDGET = int(_VMEM_LIMIT * 0.9)          # plan tiles against 90% of the limit
_SINGLE_BUFFER_OK = _probe_single_buffering()


def _maybe_single_buffer(block_shape, index_map):
    """Constant-index BlockSpec, single-buffered when the toolchain supports it."""
    if _SINGLE_BUFFER_OK:
        return pl.BlockSpec(block_shape, index_map, pipeline_mode=pl.Buffered(1))
    return pl.BlockSpec(block_shape, index_map)


# ---------------------------------------------------------------------------
# Kernels
# ---------------------------------------------------------------------------

def _adapter_kernel_resident(x_ref, wd_t_ref, bd_ref, wu_t_ref, bu_ref, o_ref):
    """Fused adapter for one row tile; both (padded) weights resident in VMEM.

    x_ref    : (tm, Fp)  input rows (native dtype, Fp % 128 == 0)
    wd_t_ref : (Fp, Ap)  W_down^T (zero-padded, single-buffered resident)
    bd_ref   : (1, Ap)   bias_down (f32)
    wu_t_ref : (Ap, Fp)  W_up^T   (zero-padded, single-buffered resident)
    bu_ref   : (1, Fp)   bias_up (f32)
    o_ref    : (tm, Fp)  output rows
    """
    # Down projection on the MXU: native-dtype operands, f32 accumulation.
    d = jnp.dot(x_ref[...], wd_t_ref[...], preferred_element_type=jnp.float32)
    d = d + bd_ref[...]
    # Exact erf-based GELU (matches torch.nn.GELU default).
    d = 0.5 * d * (1.0 + jax.lax.erf(d * _INV_SQRT2))
    # Up projection: cast the f32 activation to the weight dtype for full MXU rate.
    u = jnp.dot(d.astype(wu_t_ref.dtype), wu_t_ref[...],
                preferred_element_type=jnp.float32)
    u = u + bu_ref[...]
    # Residual: re-read x_ref (already in VMEM) rather than holding x live across
    # both matmuls -- shorter live range, less vreg/VMEM temporary pressure.
    o_ref[...] = (u + x_ref[...].astype(jnp.float32)).astype(o_ref.dtype)


def _adapter_kernel_tiled(x_ref, wd_t_ref, bd_ref, wu_t_ref, bu_ref, o_ref, acc_ref):
    """Fallback for adapters whose full weights do not fit VMEM: the adapter dim is
    a trailing reduction grid axis; partials accumulate in an f32 scratch tile.

    grid = (row tiles, adapter tiles); adapter axis marked "arbitrary".
    """
    a = pl.program_id(1)

    @pl.when(a == 0)
    def _init():
        acc_ref[...] = jnp.zeros_like(acc_ref)

    d = jnp.dot(x_ref[...], wd_t_ref[...], preferred_element_type=jnp.float32)
    d = d + bd_ref[...]
    d = 0.5 * d * (1.0 + jax.lax.erf(d * _INV_SQRT2))
    acc_ref[...] += jnp.dot(d.astype(wu_t_ref.dtype), wu_t_ref[...],
                            preferred_element_type=jnp.float32)

    @pl.when(a == pl.num_programs(1) - 1)
    def _finalize():
        o_ref[...] = (acc_ref[...] + bu_ref[...]
                      + x_ref[...].astype(jnp.float32)).astype(o_ref.dtype)


# ---------------------------------------------------------------------------
# Static tile planning (VMEM accounting)
# ---------------------------------------------------------------------------

def _pick_adapter_tile(Ap: int, cap: int) -> int:
    """Largest multiple of 128 that divides Ap and is <= cap.  The reduction axis
    must never have a partial block: out-of-bounds garbage there would pollute
    the accumulated sum (unlike the independent row axis)."""
    ta = max(128, (min(Ap, cap) // 128) * 128)
    while Ap % ta:
        ta -= 128
    return ta


def _plan(rows, Fp, Ap, x_itemsize, w_itemsize, tm_target, force_tiled):
    """Pick (path, row tile, adapter tile) from a static VMEM accounting model."""
    budget = _VMEM_BUDGET
    # dtype-native sublane multiple: 8 rows for f32, 16 for bf16, 32 for int8/fp8.
    sub = max(8, 8 * (4 // max(1, x_itemsize)))
    if rows < sub:
        tm = rows                              # full-dim block (allowed when == array dim)
    else:
        tm = max(sub, min(_round_up(tm_target, sub), _round_up(rows, sub)))

    # Resident weights (single-buffered when supported) + f32 biases.
    w_resident = 2 * Fp * Ap * w_itemsize + (Ap + Fp) * 4
    if not _SINGLE_BUFFER_OK:
        w_resident *= 2                        # toolchain will double-buffer them

    def resident_bytes(tm_):
        act = 2 * 2 * tm_ * Fp * x_itemsize    # in + out row tiles, double-buffered
        tmp = tm_ * (Ap + Fp) * 4              # f32 intermediates (d, u)
        return w_resident + act + tmp

    use_tiled = force_tiled or w_resident > budget // 2
    if not use_tiled:
        while tm > sub and resident_bytes(tm) > budget:
            tm = max(sub, _round_up(tm // 2, sub))
        if resident_bytes(tm) > budget:
            use_tiled = True
    if not use_tiled:
        return "resident", tm, None

    # Tiled path: only (Fp, ta) / (ta, Fp) weight blocks live in VMEM (double-buffered).
    def tiled_bytes(tm_, ta_):
        wt = 2 * 2 * Fp * ta_ * w_itemsize + ta_ * 4 + Fp * 4
        act = 2 * 2 * tm_ * Fp * x_itemsize
        acc = tm_ * Fp * 4
        tmp = tm_ * ta_ * 4
        return wt + act + acc + tmp

    cap = 512
    ta = _pick_adapter_tile(Ap, cap)
    while cap > 128 and tiled_bytes(tm, ta) > budget:
        cap //= 2
        ta = _pick_adapter_tile(Ap, cap)
    while tm > sub and tiled_bytes(tm, ta) > budget:
        tm = max(sub, _round_up(tm // 2, sub))
    return "tiled", tm, ta


# ---------------------------------------------------------------------------
# Public API
# ---------------------------------------------------------------------------

def prepare_adapter_params(weight_down, bias_down, weight_up, bias_up):
    """One-time preprocessing, hoisted out of the per-call path (review item):
    transpose + zero-pad the weights to lane-dense multiples of 128 (exact, since
    GELU(0) == 0 so padded adapter columns contribute nothing) and cast the biases
    to f32.  Call once at module init and pass the result to adapter_forward."""
    A, F = weight_down.shape
    Fp = _round_up(F, 128)
    Ap = _round_up(A, 128)
    if bias_down is None:
        bias_down = jnp.zeros((A,), jnp.float32)
    if bias_up is None:
        bias_up = jnp.zeros((F,), jnp.float32)
    wd_t = jnp.pad(weight_down.T, ((0, Fp - F), (0, Ap - A)))        # (Fp, Ap)
    wu_t = jnp.pad(weight_up.T, ((0, Ap - A), (0, Fp - F)))          # (Ap, Fp)
    bd = jnp.pad(bias_down.astype(jnp.float32), (0, Ap - A)).reshape(1, Ap)
    bu = jnp.pad(bias_up.astype(jnp.float32), (0, Fp - F)).reshape(1, Fp)
    return wd_t, bd, wu_t, bu


@functools.partial(jax.jit, static_argnames=("tm", "force_tiled"))
def adapter_forward(hidden_states, wd_t, bd, wu_t, bu, *, tm: int = 512,
                    force_tiled: bool = False):
    """hidden_states: [B, S, F]; (wd_t, bd, wu_t, bu) from prepare_adapter_params."""
    B, S, F = hidden_states.shape
    Fp, Ap = wd_t.shape
    rows = B * S

    x2d = hidden_states.reshape(rows, F)
    if Fp != F:                                 # lane-pad only when F is unaligned
        x2d = jnp.pad(x2d, ((0, 0), (0, Fp - F)))

    path, tm_eff, ta = _plan(rows, Fp, Ap, x2d.dtype.itemsize,
                             wd_t.dtype.itemsize, tm, force_tiled)
    n_row = pl.cdiv(rows, tm_eff)               # partial last tile masked by Pallas

    cost = pl.CostEstimate(
        flops=4 * rows * Fp * Ap + 12 * rows * Ap + 2 * rows * Fp,
        transcendentals=rows * Ap,
        bytes_accessed=(2 * rows * Fp * x2d.dtype.itemsize
                        + 2 * Fp * Ap * wd_t.dtype.itemsize + (Ap + Fp) * 4),
    )

    if path == "resident":
        grid = (n_row,)
        kernel = _adapter_kernel_resident
        in_specs = [
            pl.BlockSpec((tm_eff, Fp), lambda i: (i, 0)),        # x rows (pipelined)
            _maybe_single_buffer((Fp, Ap), lambda i: (0, 0)),    # W_down^T (resident)
            _maybe_single_buffer((1, Ap), lambda i: (0, 0)),     # b_down
            _maybe_single_buffer((Ap, Fp), lambda i: (0, 0)),    # W_up^T (resident)
            _maybe_single_buffer((1, Fp), lambda i: (0, 0)),     # b_up
        ]
        out_specs = pl.BlockSpec((tm_eff, Fp), lambda i: (i, 0))
        scratch = ()
        dims = ("parallel",)
    else:
        grid = (n_row, Ap // ta)
        kernel = _adapter_kernel_tiled
        in_specs = [
            pl.BlockSpec((tm_eff, Fp), lambda i, a: (i, 0)),     # x rows
            pl.BlockSpec((Fp, ta), lambda i, a: (0, a)),         # W_down^T tile
            pl.BlockSpec((1, ta), lambda i, a: (0, a)),          # b_down tile
            pl.BlockSpec((ta, Fp), lambda i, a: (a, 0)),         # W_up^T tile
            _maybe_single_buffer((1, Fp), lambda i, a: (0, 0)),  # b_up (resident)
        ]
        out_specs = pl.BlockSpec((tm_eff, Fp), lambda i, a: (i, 0))
        scratch = (pltpu.VMEM((tm_eff, Fp), jnp.float32),)
        dims = ("parallel", "arbitrary")

    out2d = pl.pallas_call(
        kernel,
        out_shape=jax.ShapeDtypeStruct((rows, Fp), hidden_states.dtype),
        grid_spec=pltpu.PrefetchScalarGridSpec(
            num_scalar_prefetch=0,
            grid=grid,
            in_specs=in_specs,
            out_specs=out_specs,
            scratch_shapes=scratch,
        ),
        compiler_params=pltpu.CompilerParams(
            dimension_semantics=dims,
            vmem_limit_bytes=_VMEM_LIMIT,
        ),
        cost_estimate=cost,
    )(x2d, wd_t, bd, wu_t, bu)

    if Fp != F:
        out2d = out2d[:, :F]
    return out2d.reshape(B, S, F)


def _reference(hidden_states, weight_down, bias_down, weight_up, bias_up):
    x = hidden_states @ weight_down.T + bias_down
    x = jax.nn.gelu(x, approximate=False)
    x = x @ weight_up.T + bias_up
    return x + hidden_states


if __name__ == "__main__":
    # Small shapes consistent with the module: in_feats=32, adapter_size=64.
    B, S, F, A = 2, 8, 32, 64

    key = jax.random.PRNGKey(0)
    k_x, k_wd, k_wu, k_x2 = jax.random.split(key, 4)

    hidden = jax.random.normal(k_x, (B, S, F), dtype=jnp.float32)
    # reset_parameters(): normal(std=0.001) weights, zero biases.
    weight_down = 0.001 * jax.random.normal(k_wd, (A, F), dtype=jnp.float32)
    weight_up = 0.001 * jax.random.normal(k_wu, (F, A), dtype=jnp.float32)
    bias_down = jnp.zeros((A,), dtype=jnp.float32)
    bias_up = jnp.zeros((F,), dtype=jnp.float32)

    # One-time weight preprocessing (hoisted out of the forward path).
    params = prepare_adapter_params(weight_down, bias_down, weight_up, bias_up)

    # 1) Main resident-weights path.
    out = jax.block_until_ready(adapter_forward(hidden, *params))
    ref = _reference(hidden, weight_down, bias_down, weight_up, bias_up)
    assert out.shape == (B, S, F)
    assert jnp.allclose(out, ref, atol=1e-5, rtol=1e-5), "resident path mismatch"

    # 2) Partial last row tile (rows % tm != 0) -- exercises the no-row-padding path.
    hidden2 = jax.random.normal(k_x2, (2, 20, F), dtype=jnp.float32)   # rows = 40
    out2 = jax.block_until_ready(adapter_forward(hidden2, *params, tm=16))
    ref2 = _reference(hidden2, weight_down, bias_down, weight_up, bias_up)
    assert jnp.allclose(out2, ref2, atol=1e-5, rtol=1e-5), "edge-tile mismatch"

    # 3) Adapter-dim-tiled fallback (normally only for weights too big for VMEM).
    out3 = jax.block_until_ready(adapter_forward(hidden, *params, force_tiled=True))
    assert jnp.allclose(out3, ref, atol=1e-5, rtol=1e-5), "tiled path mismatch"

    print("KERNEL_OK")
</pallas_src>

<mosaic_0001>
module attributes {stable_mosaic.version = 11 : i64} {
  func.func @_k(%arg0: i32, %arg1: memref<8x128xf32, #tpu.memory_space<vmem>>, %arg2: memref<8x128xf32, #tpu.memory_space<vmem>>, %arg3: memref<8x128xf32, #tpu.memory_space<vmem>>) attributes {dimension_semantics = [#tpu.dimension_semantics<arbitrary>], iteration_bounds = array<i64: 2>, scalar_prefetch = 0 : i64, scratch_operands = 0 : i64, tpu.core_type = #tpu.core_type<tc>, window_params = [{transform_indices = @transform_0, window_bounds = array<i64: 8, 128>}, {pipeline_mode = #tpu.pipeline_mode<synchronous>, transform_indices = @transform_1, window_bounds = array<i64: 8, 128>}, {transform_indices = @transform_2, window_bounds = array<i64: 8, 128>}]} {
    %c0 = arith.constant 0 : index
    %c0_0 = arith.constant 0 : index
    %0 = vector.load %arg1[%c0, %c0_0] : memref<8x128xf32, #tpu.memory_space<vmem>>, vector<8x128xf32>
    %c0_1 = arith.constant 0 : index
    %c0_2 = arith.constant 0 : index
    %1 = vector.load %arg2[%c0_1, %c0_2] : memref<8x128xf32, #tpu.memory_space<vmem>>, vector<8x128xf32>
    %2 = arith.addf %0, %1 : vector<8x128xf32>
    %c0_3 = arith.constant 0 : index
    %c0_4 = arith.constant 0 : index
    %3 = vector.load %arg3[%c0_3, %c0_4] : memref<8x128xf32, #tpu.memory_space<vmem>>, vector<8x128xf32>
    tpu.vector_store %arg3[%c0_3, %c0_4], %2 {strides = array<i32>} : memref<8x128xf32, #tpu.memory_space<vmem>>, vector<8x128xf32>,
    return
  }
  func.func @transform_0(%arg0: i32) -> (i32, i32) {
    %c0_i32 = arith.constant 0 : i32
    %c0_i32_0 = arith.constant 0 : i32
    return %arg0, %c0_i32 : i32, i32
  }
  func.func @transform_1(%arg0: i32) -> (i32, i32) {
    %c0_i32 = arith.constant 0 : i32
    %c0_i32_0 = arith.constant 0 : i32
    %c0_i32_1 = arith.constant 0 : i32
    return %c0_i32, %c0_i32_0 : i32, i32
  }
  func.func @transform_2(%arg0: i32) -> (i32, i32) {
    %c0_i32 = arith.constant 0 : i32
    %c0_i32_0 = arith.constant 0 : i32
    return %arg0, %c0_i32 : i32, i32
  }
}

module attributes {stable_mosaic.version = 11 : i64} {
  func.func @_adapter_kernel_resident(%arg0: i32, %arg1: memref<16x128xf32, #tpu.memory_space<vmem>>, %arg2: memref<128x128xf32, #tpu.memory_space<vmem>>, %arg3: memref<1x128xf32, #tpu.memory_space<vmem>>, %arg4: memref<128x128xf32, #tpu.memory_space<vmem>>, %arg5: memref<1x128xf32, #tpu.memory_space<vmem>>, %arg6: memref<16x128xf32, #tpu.memory_space<vmem>>) attributes {dimension_semantics = [#tpu.dimension_semantics<parallel>], iteration_bounds = array<i64: 1>, scalar_prefetch = 0 : i64, scratch_operands = 0 : i64, tpu.core_type = #tpu.core_type<tc>, window_params = [{transform_indices = @transform_0, window_bounds = array<i64: 16, 128>}, {pipeline_mode = #tpu.pipeline_mode<synchronous>, transform_indices = @transform_1, window_bounds = array<i64: 128, 128>}, {pipeline_mode = #tpu.pipeline_mode<synchronous>, transform_indices = @transform_2, window_bounds = array<i64: 1, 128>}, {pipeline_mode = #tpu.pipeline_mode<synchronous>, transform_indices = @transform_3, window_bounds = array<i64: 128, 128>}, {pipeline_mode = #tpu.pipeline_mode<synchronous>, transform_indices = @transform_4, window_bounds = array<i64: 1, 128>}, {transform_indices = @transform_5, window_bounds = array<i64: 16, 128>}]} {
    %c0 = arith.constant 0 : index
    %c0_0 = arith.constant 0 : index
    %0 = vector.load %arg1[%c0, %c0_0] : memref<16x128xf32, #tpu.memory_space<vmem>>, vector<16x128xf32>
    %c0_1 = arith.constant 0 : index
    %c0_2 = arith.constant 0 : index
    %1 = vector.load %arg2[%c0_1, %c0_2] : memref<128x128xf32, #tpu.memory_space<vmem>>, vector<128x128xf32>
    %cst = arith.constant dense<0.000000e+00> : vector<16x128xf32>
    %2 = tpu.matmul %0, %1, %cst {dimension_numbers = #tpu.dot_dimension_numbers<[1], [0], [0], [1], [0, 0, 1, 1], [], []>} : vector<16x128xf32>, vector<128x128xf32>, vector<16x128xf32> -> vector<16x128xf32>
    %c0_3 = arith.constant 0 : index
    %c0_4 = arith.constant 0 : index
    %3 = vector.load %arg3[%c0_3, %c0_4] : memref<1x128xf32, #tpu.memory_space<vmem>>, vector<1x128xf32>
    %4 = vector.broadcast %3 : vector<1x128xf32> to vector<16x128xf32>
    %5 = arith.addf %2, %4 : vector<16x128xf32>
    %cst_5 = arith.constant 5.000000e-01 : f32
    %6 = vector.broadcast %cst_5 : f32 to vector<16x128xf32>
    %7 = arith.mulf %6, %5 : vector<16x128xf32>
    %cst_6 = arith.constant 0.707106769 : f32
    %8 = vector.broadcast %cst_6 : f32 to vector<16x128xf32>
    %9 = arith.mulf %5, %8 : vector<16x128xf32>
    %10 = math.erf %9 : vector<16x128xf32>
    %cst_7 = arith.constant 1.000000e+00 : f32
    %11 = vector.broadcast %cst_7 : f32 to vector<16x128xf32>
    %12 = arith.addf %11, %10 : vector<16x128xf32>
    %13 = arith.mulf %7, %12 : vector<16x128xf32>
    %c0_8 = arith.constant 0 : index
    %c0_9 = arith.constant 0 : index
    %14 = vector.load %arg4[%c0_8, %c0_9] : memref<128x128xf32, #tpu.memory_space<vmem>>, vector<128x128xf32>
    %cst_10 = arith.constant dense<0.000000e+00> : vector<16x128xf32>
    %15 = tpu.matmul %13, %14, %cst_10 {dimension_numbers = #tpu.dot_dimension_numbers<[1], [0], [0], [1], [0, 0, 1, 1], [], []>} : vector<16x128xf32>, vector<128x128xf32>, vector<16x128xf32> -> vector<16x128xf32>
    %c0_11 = arith.constant 0 : index
    %c0_12 = arith.constant 0 : index
    %16 = vector.load %arg5[%c0_11, %c0_12] : memref<1x128xf32, #tpu.memory_space<vmem>>, vector<1x128xf32>
    %17 = vector.broadcast %16 : vector<1x128xf32> to vector<16x128xf32>
    %18 = arith.addf %15, %17 : vector<16x128xf32>
    %c0_13 = arith.constant 0 : index
    %c0_14 = arith.constant 0 : index
    %19 = vector.load %arg1[%c0_13, %c0_14] : memref<16x128xf32, #tpu.memory_space<vmem>>, vector<16x128xf32>
    %20 = arith.addf %18, %19 : vector<16x128xf32>
    %c0_15 = arith.constant 0 : index
    %c0_16 = arith.constant 0 : index
    %21 = vector.load %arg6[%c0_15, %c0_16] : memref<16x128xf32, #tpu.memory_space<vmem>>, vector<16x128xf32>
    tpu.vector_store %arg6[%c0_15, %c0_16], %20 {strides = array<i32>} : memref<16x128xf32, #tpu.memory_space<vmem>>, vector<16x128xf32>,
    return
  }
  func.func @transform_0(%arg0: i32) -> (i32, i32) {
    %c0_i32 = arith.constant 0 : i32
    %c0_i32_0 = arith.constant 0 : i32
    return %arg0, %c0_i32 : i32, i32
  }
  func.func @transform_1(%arg0: i32) -> (i32, i32) {
    %c0_i32 = arith.constant 0 : i32
    %c0_i32_0 = arith.constant 0 : i32
    %c0_i32_1 = arith.constant 0 : i32
    return %c0_i32, %c0_i32_0 : i32, i32
  }
  func.func @transform_2(%arg0: i32) -> (i32, i32) {
    %c0_i32 = arith.constant 0 : i32
    %c0_i32_0 = arith.constant 0 : i32
    %c0_i32_1 = arith.constant 0 : i32
    return %c0_i32, %c0_i32_0 : i32, i32
  }
  func.func @transform_3(%arg0: i32) -> (i32, i32) {
    %c0_i32 = arith.constant 0 : i32
    %c0_i32_0 = arith.constant 0 : i32
    %c0_i32_1 = arith.constant 0 : i32
    return %c0_i32, %c0_i32_0 : i32, i32
  }
  func.func @transform_4(%arg0: i32) -> (i32, i32) {
    %c0_i32 = arith.constant 0 : i32
    %c0_i32_0 = arith.constant 0 : i32
    %c0_i32_1 = arith.constant 0 : i32
    return %c0_i32, %c0_i32_0 : i32, i32
  }
  func.func @transform_5(%arg0: i32) -> (i32, i32) {
    %c0_i32 = arith.constant 0 : i32
    %c0_i32_0 = arith.constant 0 : i32
    return %arg0, %c0_i32 : i32, i32
  }
}

</mosaic_0001>

<bundles_post_ra>
// kernel: tpu_custom_call.1
= control target key start
LH: loop header
LB: loop body
LE: loop exit
PB: predicated region body
PF: predicated region fallthrough
CT: control target
= control target key end

     0   :  { %7 = vsyncpa [#allocation3], 0  ;;  %s690_s0 = inlined_call_operand.hbm [shape: f32[16,128], index: 0, kind: input, shape index: {}]   ;;  %s691_s1 = inlined_call_operand.hbm [shape: f32[8,128], index: 1, kind: input, shape index: {}]   ;;  %s692_s2 = inlined_call_operand.hbm [shape: f32[16,128], index: 2, kind: output, shape index: {}]  }
   0x1   :  { %9 = vsyncpa [#allocation3 + $0x1], 0 }
   0x2   :  { %10 = vsyncpa [#allocation6], 0 }
   0x3   :  { %11 = vsyncpa [#allocation4], 0 }
   0x4   :  { %13 = vsyncpa [#allocation4 + $0x1], 0  ;;  %s489_s9 = smov 0   ;;  %s491_s10 = smov 0  }
   0x5   :  { %s493_s11 = smov 0   ;;  %s495_s12 = smov 0  }
   0x6 LB: > { %s510_s13 = sadd.s32 4294967295, %s469_s12   ;;  %s270_s14 = sadd.s32 4294967294, %s469_s12   ;;  %s469_s12 = sphi %s495_s12, %s716_s12   ;;  %s465_s11 = sphi %s493_s11, %s715_s11   ;;  %s461_s10 = sphi %s491_s10, %s714_s10   ;;  %s457_s9 = sphi %s489_s9, %s713_s9  }
   0x7   : > { %p39_p0 = scmp.ne.s32.totalorder %s461_s10, %s457_s9  ;;  %p693_p1 = scmp.eq.s32.totalorder %s510_s13, 0 }
   0x8   : > { %p90_p3 = scmp.eq.s32.totalorder %s270_s14, 1  ;;  %p271_p5 = scmp.ge.s32.totalorder %s469_s12, 1 }
   0x9   : > { %p519_p4 = por %p693_p1, %p39_p0  ;;  %p97_p7 = scmp.lt.s32.totalorder %s469_s12, 3 }
   0xa   : > { %p524_p6 = por %p90_p3, %p39_p0  ;;  %s471_s18 = smov [#allocation5]  }
   0xb   : > { %s696_s15 = scalar_select %p519_p4, 1, 0 }
   0xc   : > { %s697_s16 = scalar_select %p524_p6, 1, 0 }
   0xd   : > { %p529_p8 = pnand %p271_p5, %p97_p7  ;;  %s110_s19 = sshll.u32 %s471_s18, 4  ;;  %s111_s19 = int_to_ptr.vmem [resolvable:$true] %s110_s19 }
   0xe   : > { %s537_s20 = sadd.s32 1, %s469_s12   ;;  %s26_s24 = sadd.s32 1, %s465_s11 }
   0xf   : > { %s698_s17 = scalar_select %p529_p8, 1, 0 }
  0x10   : > { %p292_p10 = pneg %p529_p8  ;;  %s23_s22 = ssub.s32 %s469_s12, %s537_s20 }
  0x11   : > { %p547_p12 = scmp.eq.s32.totalorder %s23_s22, 0  ;;  %s341_s27 = scalar_lea.hbm %s691_s1, 128 }
  0x12   : > { %p541_p11 = pnand %p292_p10, %p693_p1  ;;  %p342_p0 = scmp.ne.s32.totalorder %s691_s1, %s341_s27 }
  0x13   : > { %s700_s23 = scalar_select %p547_p12, 1, 0 }
  0x14   : > { %p343_p3 = pneg %p541_p11  ;;  %p348_p10 = scmp.lt.u32.totalorder %s341_s27, %s691_s1 }
  0x16   : > { %p344_p5 = pnand %p343_p3, %p342_p0 }
  0x18   : > { %p345_p7 = pneg %p344_p5 }
  0x1a   : > { %p350_p9 = pnand %p348_p10, %p345_p7 }
  0x1c   : > { %353 = shalt.err (!%p350_p9)
}
  0x1d   : > { %s354_s4 = scalar_lea.vmem %s111_s19, 128  ;;  %p362_p6 = scmp.lt.s32.totalorder %s111_s19, %s111_s19 }
  0x1e   : > { %p355_p1 = scmp.ne.s32.totalorder %s111_s19, %s354_s4  ;;  %p363_p4 = scmp.lt.s32.totalorder %s354_s4, %s354_s4 }
  0x20   : > { %p357_p2 = pnand %p355_p1, %p343_p3  ;;  %p364_p8 = por %p363_p4, %p362_p6 }
  0x22   : > { %p358_p13 = pneg %p357_p2 }
  0x24   : > { %p365_p12 = pnand %p364_p8, %p358_p13 }
  0x26   : > { %368 = shalt.err (!%p365_p12)
}
  0x27   : > { %295 = dma.hbm_to_vmem [thread:$0]  (!%p541_p11), %s691_s1, 128, %s111_s19, [#allocation6]  }
  0x28   : > { %p701_p1 = scmp.ne.s32.totalorder %s700_s23, 0  ;;  %p34_p2 = scmp.eq.s32.totalorder %s469_s12, 0 }
  0x29   : > { %p702_p4 = scmp.ne.s32.totalorder %s465_s11, %s461_s10  ;;  %p703_p6 = scmp.eq.s32.totalorder %s510_s13, 1 }
  0x2a   : > { %s573_s7 = scalar_select %p701_p1, %s465_s11, %s26_s24  }
  0x2b   : > { %p581_p8 = por %p703_p6, %p702_p4  ;;  %p305_p9 = scmp.lt.s32.totalorder %s469_s12, 2 }
  0x2c   : > { %s121_s14 = sand.u32 1, %s465_s11   ;;  %p705_p12 = pmov %p702_p4 }
  0x2d   : > { %s274_s18 = sshll.u32 %s121_s14, 3  ;;  %s275_s21 = sshll.u32 %s469_s12, 7 }
  0x2e   : > { %p35_p13 = por %p34_p2, %p705_p12  ;;  %s594_s19 = scalar_lea.hbm %s690_s0, %s275_s21 }
  0x2f   : > { %s125_s23 = scalar_lea.vmem [#allocation2], %s274_s18  ;;  %s122_s27 = scalar_lea.sflag [#allocation3], %s121_s14 }
  0x30   : > { %s132_s24 = sshll.u32 %s125_s23, 4  ;;  %p596_p11 = pnand %p305_p9, %p35_p13  ;;  %s600_s24 = int_to_ptr.vmem [resolvable:$true] %s132_s24 }
  0x31   : > { %s369_s28 = scalar_lea.hbm %s594_s19, 128  ;;  %s374_s3 = scalar_lea.hbm %s690_s0, 256 }
  0x32   : > { %p370_p0 = scmp.ne.s32.totalorder %s594_s19, %s369_s28  ;;  %p371_p3 = pneg %p596_p11 }
  0x33   : > { %p375_p10 = scmp.lt.u32.totalorder %s594_s19, %s690_s0  ;;  %p376_p1 = scmp.lt.u32.totalorder %s374_s3, %s369_s28 }
  0x34   : > { %p372_p5 = pnand %p371_p3, %p370_p0  ;;  %p378_p4 = scmp.lt.u32.totalorder %s369_s28, %s594_s19 }
  0x35   : > { %p377_p2 = por %p376_p1, %p375_p10 }
  0x36   : > { %p373_p7 = pneg %p372_p5 }
  0x37   : > { %p379_p6 = por %p378_p4, %p377_p2 }
  0x39   : > { %p380_p9 = pnand %p379_p6, %p373_p7 }
  0x3b   : > { %383 = shalt.err (!%p380_p9)
}
  0x3c   : > { %s384_s6 = scalar_lea.vmem %s600_s24, 128  ;;  %s472_s14 = smov [#allocation2]  }
  0x3d   : > { %p385_p12 = scmp.ne.s32.totalorder %s600_s24, %s384_s6  ;;  %s389_s18 = sshll.u32 %s472_s14, 4  ;;  %s390_s18 = int_to_ptr.vmem [resolvable:$false] %s389_s18 }
  0x3e   : > { %s391_s21 = scalar_lea.vmem %s390_s18, 256  ;;  %p392_p5 = scmp.lt.s32.totalorder %s600_s24, %s390_s18 }
  0x3f   : > { %p387_p13 = pnand %p385_p12, %p371_p3  ;;  %p393_p10 = scmp.lt.s32.totalorder %s391_s21, %s384_s6 }
  0x41   : > { %p388_p0 = pneg %p387_p13  ;;  %p394_p1 = por %p393_p10, %p392_p5 }
  0x43   : > { %p395_p2 = pnand %p394_p1, %p388_p0 }
  0x45   : > { %398 = shalt.err (!%p395_p2)
}
  0x46   : > { %299 = dma.hbm_to_vmem [thread:$0]  (!%p596_p11), %s594_s19, 128, %s600_s24, %s122_s27  }
  0x47   : > { %p707_p7 = scmp.ne.s32.totalorder %s698_s17, 0 }
  0x48   : > { %s630_s22 = sand.u32 (!%p707_p7), 1, %s461_s10   ;;  %p708_p3 = scmp.ne.s32.totalorder (!%p707_p7), %s696_s15, 0 }
  0x49   : > { %141 = sbr.rel (%p707_p7) target bundleno = 109 (0x6d), region = 28  ;;  %s277_s25 = sshll.u32 (!%p707_p7), %s630_s22, 3 }
  0x4a   : > { %s144_s23 = scalar_lea.sflag (!%p707_p7), [#allocation3], %s630_s22  ;;  %s147_s28 = scalar_lea.vmem (!%p707_p7), [#allocation2], %s277_s25 }
  0x50   : > { %444 = dma.done.wait (%p708_p3), %s144_s23, 128  }
  0x51   : > { %446 = vsyncadd (%p708_p3), %s144_s23, 4294967168  ;;  %p709_p4 = scmp.eq.s32.totalorder %s510_s13, 0 }
  0x53   : > { %448 = dma.done.wait (%p709_p4), [#allocation6], 128   ;;  %p710_p11 = pmov %p709_p4 }
  0x54   : > { %s171_s17 = scalar_lea.vmem [#allocation7], %s277_s25  ;;  %s281_s24 = sshll.u32 %s510_s13, 7  ;;  %v172_v0 = vld [vmem:[%s147_s28] sm:$0xff]  ;;  %v173_v1 = vld [vmem:[#allocation5] sm:$0xff] }
  0x55   : > { %450 = vsyncadd (%p710_p11), [#allocation6], 4294967168  ;;  %s190_s19 = sshll.u32 %s171_s17, 4  ;;  %v174_v2 = vadd.f32 %v173_v1, %v172_v0  ;;  %s648_s27 = scalar_lea.hbm %s692_s2, %s281_s24  ;;  %s643_s19 = int_to_ptr.vmem [resolvable:$true] %s190_s19 }
  0x56   : > { %s177_s29 = scalar_lea.sflag [#allocation4], %s630_s22  ;;  %s399_s30 = scalar_lea.vmem %s643_s19, 128 }
  0x57   : > { %175 = vst [vmem:[%s171_s17] sm:$0xff] %v174_v2  ;;  %p400_p6 = scmp.ne.s32.totalorder %s643_s19, %s399_s30  ;;  %s473_s13 = smov [#allocation7]  }
  0x58   : > { %s403_s3 = sshll.u32 %s473_s13, 4  ;;  %s404_s3 = int_to_ptr.vmem [resolvable:$false] %s403_s3 }
  0x59   : > { %p401_p9 = pnand %p400_p6, %p581_p8  ;;  %s405_s4 = scalar_lea.vmem %s404_s3, 256 }
  0x5a   : > { %p406_p13 = scmp.lt.s32.totalorder %s643_s19, %s404_s3  ;;  %p407_p0 = scmp.lt.s32.totalorder %s405_s4, %s399_s30 }
  0x5b   : > { %p402_p12 = pneg %p401_p9 }
  0x5c   : > { %p408_p5 = por %p407_p0, %p406_p13 }
  0x5e   : > { %p409_p10 = pnand %p408_p5, %p402_p12 }
  0x60   : > { %412 = shalt.err (!%p409_p10)
}
  0x61   : > { %s413_s5 = scalar_lea.hbm %s648_s27, 128  ;;  %s417_s18 = scalar_lea.hbm %s692_s2, 256 }
  0x62   : > { %p414_p1 = scmp.ne.s32.totalorder %s648_s27, %s413_s5  ;;  %p418_p3 = scmp.lt.u32.totalorder %s648_s27, %s692_s2 }
  0x63   : > { %p419_p4 = scmp.lt.u32.totalorder %s417_s18, %s413_s5  ;;  %p421_p6 = scmp.lt.u32.totalorder %s413_s5, %s648_s27 }
  0x64   : > { %p415_p2 = pnand %p414_p1, %p581_p8 }
  0x65   : > { %p420_p11 = por %p419_p4, %p418_p3 }
  0x66   : > { %p416_p7 = pneg %p415_p2 }
  0x67   : > { %p422_p9 = por %p421_p6, %p420_p11 }
  0x69   : > { %p423_p12 = pnand %p422_p9, %p416_p7 }
  0x6b   : > { %426 = shalt.err (!%p423_p12)
}
  0x6c   : > { %290 = dma.vmem_to_hbm [thread:$0]  (%p581_p8), %s643_s19, 128, %s648_s27, %s177_s29  }
  0x6d PF: > { %s202_s25 = sand.u32 1, %s457_s9   ;;  %p711_p13 = scmp.ne.s32.totalorder %s697_s16, 0 }
  0x6e   : > { %p712_p0 = scmp.ge.s32.totalorder %s469_s12, 2  ;;  %s203_s23 = scalar_lea.sflag [#allocation4], %s202_s25 }
  0x70   : > { %p301_p5 = pnand %p712_p0, %p711_p13 }
  0x72   : > { %452 = dma.done.wait (!%p301_p5), %s203_s23, 128  }
  0x73   : > { %454 = vsyncadd (!%p301_p5), %s203_s23, 4294967168  ;;  %p16_p10 = scmp.ge.s32.totalorder %s537_s20, 4   ;;  %s713_s9 = smov %s461_s10 }
  0x74   : > { %s714_s10 = smov %s465_s11  ;;  %s715_s11 = smov %s573_s7 }
  0x75   : > { %s716_s12 = smov %s537_s20  ;;  %18 = sbr.rel (!%p16_p10) target bundleno = 6 (0x6), region = 77 }
  0x7c   :  { %208 = vsyncpa [#allocation3], 1 }
  0x7d   :  { %210 = vsyncpa [#allocation3 + $0x1], 1 }
  0x7e   :  { %211 = vsyncpa [#allocation6], 1 }
  0x7f   :  { %212 = vsyncpa [#allocation4], 1 }
  0x80   :  { %214 = vsyncpa [#allocation4 + $0x1], 1 }

// kernel: adapter_forward.1
= control target key start
LH: loop header
LB: loop body
LE: loop exit
PB: predicated region body
PF: predicated region fallthrough
CT: control target
= control target key end

     0   :  { %10 = vsyncpa [#allocation3], 0  ;;  %s574_s0 = inlined_call_operand.vmem [shape: f32[16,128], index: 0, kind: input, shape index: {}]   ;;  %s575_s1 = inlined_call_operand.hbm [shape: f32[128,128], index: 1, kind: input, shape index: {}]   ;;  %s576_s2 = inlined_call_operand.vmem [shape: f32[1,128], index: 2, kind: input, shape index: {}]   ;;  %s577_s3 = inlined_call_operand.hbm [shape: f32[128,128], index: 3, kind: input, shape index: {}]   ;;  %s578_s4 = inlined_call_operand.vmem [shape: f32[1,128], index: 4, kind: input, shape index: {}]   ;;  %s579_s5 = inlined_call_operand.vmem [shape: f32[16,128], index: 5, kind: output, shape index: {}]  }
   0x1   :  { %11 = vsyncpa [#allocation5], 0  ;;  %s494_s18 = smov [#allocation2]   ;;  %s446_s22 = scalar_lea.hbm %s575_s1, 2048 }
   0x2   :  { %s19_s19 = sshll.u32 %s494_s18, 4  ;;  %p447_p0 = scmp.ne.s32.totalorder %s575_s1, %s446_s22  ;;  %s20_s19 = int_to_ptr.vmem [resolvable:$true] %s19_s19 }
   0x3   :  { %p450_p1 = scmp.lt.u32.totalorder %s446_s22, %s575_s1 }
   0x5   :  { %p452_p2 = pnand %p450_p1, %p447_p0 }
   0x7   :  { %455 = shalt.err (!%p452_p2)
}
   0x8   :  { %s456_s27 = scalar_lea.vmem %s20_s19, 2048  ;;  %p461_p4 = scmp.lt.s32.totalorder %s20_s19, %s20_s19 }
   0x9   :  { %p457_p3 = scmp.ne.s32.totalorder %s20_s19, %s456_s27  ;;  %p462_p5 = scmp.lt.s32.totalorder %s456_s27, %s456_s27 }
   0xb   :  { %p463_p6 = por %p462_p5, %p461_p4 }
   0xd   :  { %p464_p7 = pnand %p463_p6, %p457_p3 }
   0xf   :  { %467 = shalt.err (!%p464_p7)
}
  0x10   :  { %s495_s28 = smov 128   ;;  %s496_s29 = smov 8  }
  0x11   :  { %25 = dma.hbm_to_vmem [thread:$0]  %s575_s1, 2048, %s20_s19, [#allocation3], %s495_s28, %s495_s28, %s496_s29  }
  0x12   :  { %s497_s7 = smov [#allocation4]   ;;  %s468_s11 = scalar_lea.hbm %s577_s3, 2048 }
  0x13   :  { %s33_s8 = sshll.u32 %s497_s7, 4  ;;  %p469_p8 = scmp.ne.s32.totalorder %s577_s3, %s468_s11  ;;  %s34_s8 = int_to_ptr.vmem [resolvable:$true] %s33_s8 }
  0x14   :  { %p472_p9 = scmp.lt.u32.totalorder %s468_s11, %s577_s3 }
  0x16   :  { %p474_p10 = pnand %p472_p9, %p469_p8 }
  0x18   :  { %477 = shalt.err (!%p474_p10)
}
  0x19   :  { %s478_s16 = scalar_lea.vmem %s34_s8, 2048  ;;  %p483_p12 = scmp.lt.s32.totalorder %s34_s8, %s34_s8 }
  0x1a   :  { %p479_p11 = scmp.ne.s32.totalorder %s34_s8, %s478_s16  ;;  %p484_p13 = scmp.lt.s32.totalorder %s478_s16, %s478_s16 }
  0x1c   :  { %p485_p0 = por %p484_p13, %p483_p12 }
  0x1e   :  { %p486_p1 = pnand %p485_p0, %p479_p11 }
  0x20   :  { %489 = shalt.err (!%p486_p1)
}
  0x21   :  { %39 = dma.hbm_to_vmem [thread:$0]  %s577_s3, 2048, %s34_s8, [#allocation5], %s495_s28, %s495_s28, %s496_s29  }
  0x22   :  { %490 = dma.done.wait [#allocation3], 2048  }
  0x23   :  { %491 = vsyncadd [#allocation3], 4294965248 }
  0x24   :  { %492 = dma.done.wait [#allocation5], 2048  }
  0x25   :  { %493 = vsyncadd [#allocation5], 4294965248  ;;  %v50_v0 = vld [vmem:[#allocation2] sm:$0xff]  ;;  %v51_v1 = vld [vmem:[#allocation2 + $0x8] sm:$0xff] }
  0x26   :  { %v52_v2 = vld [vmem:[#allocation2 + $0x10] sm:$0xff]  ;;  %v374_v3 = vpack.c.bf16 %v51_v1, %v50_v0  ;;  %v53_v4 = vld [vmem:[#allocation2 + $0x18] sm:$0xff]  ;;  %v54_v6 = vld [vmem:[#allocation2 + $0x20] sm:$0xff] }
  0x27   :  { %v378_v5 = vpack.c.bf16 %v53_v4, %v52_v2  ;;  %v55_v7 = vld [vmem:[#allocation2 + $0x28] sm:$0xff]  ;;  %v56_v9 = vld [vmem:[#allocation2 + $0x30] sm:$0xff]  ;;  %v57_v10 = vld [vmem:[#allocation2 + $0x38] sm:$0xff] }
  0x28   :  { %375 = vmatprep.subr.bf16.mxu0 %v374_v3  ;;  %v382_v8 = vpack.c.bf16 %v55_v7, %v54_v6  ;;  %v555_v11 = vld [vmem:[%s574_s0] sm:$0xff]  ;;  %v159_v13 = vld [vmem:[#allocation4 + $0x8] sm:$0xff]  ;;  %v160_v14 = vld [vmem:[#allocation4 + $0x10] sm:$0xff]  ;;  %v386_v20 = vpack.c.bf16 %v57_v10, %v56_v9 }
  0x29   :  { %377 = vmatpush3.bf16.msra.mxu0 %v374_v3  ;;  %336 = vmatprep.mubr.f32.mxu0 %v555_v11  ;;  %v158_v12 = vld [vmem:[#allocation4] sm:$0xff]  ;;  %v161_v16 = vld [vmem:[#allocation4 + $0x18] sm:$0xff]  ;;  %v163_v19 = vld [vmem:[#allocation4 + $0x28] sm:$0xff] }
  0x2a   :  { %379 = vmatprep.subr.bf16.mxu0 %v378_v5  ;;  %v406_v15 = vpack.c.bf16 %v159_v13, %v158_v12  ;;  %v410_v17 = vpack.c.bf16 %v161_v16, %v160_v14  ;;  %v162_v18 = vld [vmem:[#allocation4 + $0x20] sm:$0xff]  ;;  %v59_v22 = vld [vmem:[#allocation2 + $0x48] sm:$0xff]  ;;  %v60_v25 = vld [vmem:[#allocation2 + $0x50] sm:$0xff] }
  0x2b   :  { %v58_v21 = vld [vmem:[#allocation2 + $0x40] sm:$0xff]  ;;  %v414_v23 = vpack.c.bf16 %v163_v19, %v162_v18  ;;  %v61_v26 = vld [vmem:[#allocation2 + $0x58] sm:$0xff]  ;;  %v63_v29 = vld [vmem:[#allocation2 + $0x68] sm:$0xff] }
  0x2c   :  { %407 = vmatprep.subr.bf16.mxu1 %v406_v15  ;;  %v390_v24 = vpack.c.bf16 %v59_v22, %v58_v21  ;;  %v394_v27 = vpack.c.bf16 %v61_v26, %v60_v25  ;;  %v62_v28 = vld [vmem:[#allocation2 + $0x60] sm:$0xff]  ;;  %v64_v31 = vld [vmem:[#allocation2 + $0x70] sm:$0xff]  ;;  %v65_v32 = vld [vmem:[#allocation2 + $0x78] sm:$0xff] }
  0x2d   :  { %381 = vmatpush3.bf16.msra.mxu0 %v378_v5  ;;  %409 = vmatpush3.bf16.msra.mxu1 %v406_v15  ;;  %v398_v30 = vpack.c.bf16 %v63_v29, %v62_v28  ;;  %v402_v33 = vpack.c.bf16 %v65_v32, %v64_v31  ;;  %v49_v34 = vld [vmem:[%s574_s0 + $0x8] sm:$0xff]  ;;  %v164_v35 = vld [vmem:[#allocation4 + $0x30] sm:$0xff]  ;;  %v165_v36 = vld [vmem:[#allocation4 + $0x38] sm:$0xff] }
  0x2e   :  { %383 = vmatprep.subr.bf16.mxu0 %v382_v8  ;;  %411 = vmatprep.subr.bf16.mxu1 %v410_v17  ;;  %v418_v37 = vpack.c.bf16 %v165_v36, %v164_v35  ;;  %v166_v38 = vld [vmem:[#allocation4 + $0x40] sm:$0xff]  ;;  %v167_v39 = vld [vmem:[#allocation4 + $0x48] sm:$0xff]  ;;  %v168_v41 = vld [vmem:[#allocation4 + $0x50] sm:$0xff] }
  0x2f   :  { %v422_v40 = vpack.c.bf16 %v167_v39, %v166_v38  ;;  %v169_v42 = vld [vmem:[#allocation4 + $0x58] sm:$0xff]  ;;  %v170_v44 = vld [vmem:[#allocation4 + $0x60] sm:$0xff]  ;;  %v171_v45 = vld [vmem:[#allocation4 + $0x68] sm:$0xff] }
  0x30   :  { %v426_v43 = vpack.c.bf16 %v169_v42, %v168_v41  ;;  %v430_v46 = vpack.c.bf16 %v171_v45, %v170_v44  ;;  %v172_v47 = vld [vmem:[#allocation4 + $0x70] sm:$0xff]  ;;  %v173_v48 = vld [vmem:[#allocation4 + $0x78] sm:$0xff]  ;;  %v266_v50 = vld [vmem:[%s576_s2] ss:$0 sm:$0xff] }
  0x31   :  { %385 = vmatpush3.bf16.msra.mxu0 %v382_v8  ;;  %413 = vmatpush3.bf16.msra.mxu1 %v410_v17  ;;  %v434_v49 = vpack.c.bf16 %v173_v48, %v172_v47  ;;  %v267_v1 = vld [vmem:[%s578_s4] ss:$0 sm:$0xff] }
  0x32   :  { %387 = vmatprep.subr.bf16.mxu0 %v386_v20  ;;  %415 = vmatprep.subr.bf16.mxu1 %v414_v23 }
  0x35   :  { %389 = vmatpush3.bf16.msra.mxu0 %v386_v20  ;;  %417 = vmatpush3.bf16.msra.mxu1 %v414_v23 }
  0x36   :  { %391 = vmatprep.subr.bf16.mxu0 %v390_v24  ;;  %419 = vmatprep.subr.bf16.mxu1 %v418_v37 }
  0x39   :  { %393 = vmatpush3.bf16.msra.mxu0 %v390_v24  ;;  %421 = vmatpush3.bf16.msra.mxu1 %v418_v37 }
  0x3a   :  { %395 = vmatprep.subr.bf16.mxu0 %v394_v27  ;;  %423 = vmatprep.subr.bf16.mxu1 %v422_v40 }
  0x3d   :  { %397 = vmatpush3.bf16.msra.mxu0 %v394_v27  ;;  %425 = vmatpush3.bf16.msra.mxu1 %v422_v40 }
  0x3e   :  { %399 = vmatprep.subr.bf16.mxu0 %v398_v30  ;;  %427 = vmatprep.subr.bf16.mxu1 %v426_v43 }
  0x41   :  { %401 = vmatpush3.bf16.msra.mxu0 %v398_v30  ;;  %429 = vmatpush3.bf16.msra.mxu1 %v426_v43 }
  0x42   :  { %403 = vmatprep.subr.bf16.mxu0 %v402_v33  ;;  %431 = vmatprep.subr.bf16.mxu1 %v430_v46 }
  0x45   :  { %405 = vmatpush3.bf16.msra.mxu0 %v402_v33  ;;  %433 = vmatpush3.bf16.msra.mxu1 %v430_v46 }
  0x46   :  { %435 = vmatprep.subr.bf16.mxu1 %v434_v49 }
  0x48   :  { %337 = vmatmul.mubr.f32.vlgmr.msra.gmra.mrb[0].mxu0 %v49_v34 }
  0x49   :  { %437 = vmatpush3.bf16.msra.mxu1 %v434_v49 }
 0x11b   :  { %v338_v51 = vpop.f32.mrb[0].mxu0 }
 0x11c   :  { %v145_v52 = vadd.f32 %v338_v51, %v266_v50  ;;  %v139_v53 = vpop.f32.mrb[1].mxu0 }
 0x11d   :  { %v140_v54 = vadd.f32 %v266_v50, %v139_v53 }
 0x11e   :  { %v151_v55 = vmul.f32 0.70710677, %v145_v52  ;;  %v149_v62 = vmul.f32 0.5, %v145_v52 }
 0x11f   :  { %v150_v56 = vmul.f32 0.70710677, %v140_v54  ;;  %v148_v60 = vmul.f32 0.5, %v140_v54 }
 0x120   :  { %442 = verf.f32 %v151_v55 }
 0x121   :  { %444 = verf.f32 %v150_v56 }
 0x12a   :  { %v443_v57 = vpop.eup %442 }
 0x12b   :  { %v445_v58 = vpop.eup %444  ;;  %v155_v59 = vadd.f32 1.0, %v443_v57 }
 0x12c   :  { %v154_v61 = vadd.f32 1.0, %v445_v58 }
 0x12d   :  { %v157_v0 = vmul.f32 %v155_v59, %v149_v62 }
 0x12e   :  { %v156_v63 = vmul.f32 %v154_v61, %v148_v60 }
 0x130   :  { %371 = vmatprep.mubr.f32.mxu1 %v156_v63 }
 0x131   :  { %372 = vmatmul.mubr.f32.vlgmr.msra.gmra.mrb[0].mxu1 %v157_v0 }
 0x204   :  { %v373_v2 = vpop.f32.mrb[0].mxu1 }
 0x205   :  { %v253_v3 = vadd.f32 %v373_v2, %v267_v1  ;;  %v247_v4 = vpop.f32.mrb[1].mxu1 }
 0x206   :  { %v248_v5 = vadd.f32 %v267_v1, %v247_v4 }
 0x207   :  { %v257_v6 = vadd.f32 %v253_v3, %v49_v34 }
 0x208   :  { %v256_v7 = vadd.f32 %v248_v5, %v555_v11 }
 0x209   :  { %259 = vst [vmem:[%s579_s5 + $0x8] sm:$0xff] %v257_v6 }
 0x20a   :  { %258 = vst [vmem:[%s579_s5] sm:$0xff] %v256_v7 }
 0x20b   :  { %264 = vsyncpa [#allocation3], 1 }
 0x20c   :  { %265 = vsyncpa [#allocation5], 1 }

</bundles_post_ra>
